<compile_context>
chip_gen: v7x
topology: tpu7x:2x2x1
jax: 0.10.0
libtpu: 0.0.40
codegen_flags: <defaults>
</compile_context>

<pallas_src>
import numpy as np
import jax
import jax.numpy as jnp
from jax.experimental import pallas as pl
from jax.experimental.pallas import tpu as pltpu


def _time2vec_kernel(x_ref, g_ref, scale_ref, shift_ref, sinm_ref, out_ref):
    """One batch tile of Time2Vec.

    x_ref     : (TB, D)    input rows (batch tail zero-padded by the wrapper)
    g_ref     : (D, Fp)    0/1 one-hot gather matrix: column m selects x[:, src[m]]
    scale_ref : (1, Fp)    fused per-output-lane scale (w0 | W, interleaved)
    shift_ref : (1, Fp)    fused per-output-lane shift (phi0 | Phi, interleaved)
    sinm_ref  : (1, Fp)    int32: 1 on sin lanes, 0 on 'original' / pad lanes
    out_ref   : (TB, Fp)   flattened, lane-dense output tile
    """
    # Replicate x into the interleaved output layout on the (otherwise idle)
    # MXU.  precision=HIGHEST keeps the full f32 mantissa of x; with a strict
    # 0/1 matrix the gather result is x[:, src[m]] to within ~1 ulp.
    xg = jnp.dot(
        x_ref[...],
        g_ref[...],
        preferred_element_type=jnp.float32,
        precision=jax.lax.Precision.HIGHEST,
    )
    # Single fused elementwise stream on the VPU; sin is only *kept* on the
    # k-of-od periodic lanes (the 1/od wasted sin is cheaper than any lane
    # shuffling or partial masked stores).
    lin = xg * scale_ref[...] + shift_ref[...]
    out_ref[...] = jnp.where(sinm_ref[...] != 0, jnp.sin(lin), lin).astype(out_ref.dtype)


def time2vec(x, w0, phi0, W, Phi, *, block_b=4096):
    """Time2Vec forward. x: (B, D). Returns (B, od, D), matching the nn.Module."""
    B, D = x.shape
    k = W.shape[1]
    od = k + 1
    F = D * od
    Fp = max(128, pl.cdiv(F, 128) * 128)        # lane-dense (multiple-of-128) width

    # --- fuse parameters into the final flattened / interleaved lane layout:
    #     flat lane m = i*od + j :  j == 0 -> "original" term of feature i
    #                               j >= 1 -> sin term (i, j-1), x column (i*k+j-1) % D
    scale = jnp.concatenate([w0.reshape(D, 1), W], axis=1).reshape(1, F)
    shift = jnp.concatenate([phi0.reshape(D, 1), Phi], axis=1).reshape(1, F)
    if Fp != F:
        scale = jnp.pad(scale, ((0, 0), (0, Fp - F)))
        shift = jnp.pad(shift, ((0, 0), (0, Fp - F)))

    m = np.arange(Fp)
    i_idx, j_idx = m // od, m % od
    valid = m < F
    src = np.where(valid, np.where(j_idx == 0, i_idx, (i_idx * k + j_idx - 1) % D), 0)
    # Strict 0/1 one-hot gather matrix (D, Fp); zero columns on pad lanes.
    gmat = jnp.asarray(
        ((np.arange(D)[:, None] == src[None, :]) & valid[None, :]).astype(np.float32)
    ).astype(x.dtype)
    sinm = jnp.asarray(((j_idx != 0) & valid).astype(np.int32)).reshape(1, Fp)

    # --- batch padding + tiling ----------------------------------------------
    Bp = pl.cdiv(B, 8) * 8                      # sublane-align the row count
    x_in = jnp.pad(x, ((0, Bp - B), (0, 0))) if Bp != B else x

    TB = min(block_b, Bp)
    if TB >= Bp and Bp >= 16:
        # Never collapse to a single grid step: keep both v7x TensorCores busy
        # and give the DMA pipeline something to overlap.
        TB = pl.cdiv(Bp, 2)
    TB = max(8, (TB // 8) * 8)                  # sublane-aligned tile
    grid = (pl.cdiv(Bp, TB),)

    out_flat = pl.pallas_call(
        _time2vec_kernel,
        out_shape=jax.ShapeDtypeStruct((Bp, Fp), x.dtype),
        grid=grid,
        in_specs=[
            pl.BlockSpec((TB, D), lambda b: (b, 0)),    # x tile
            pl.BlockSpec((D, Fp), lambda b: (0, 0)),    # one-hot gather matrix
            pl.BlockSpec((1, Fp), lambda b: (0, 0)),    # fused scale
            pl.BlockSpec((1, Fp), lambda b: (0, 0)),    # fused shift
            pl.BlockSpec((1, Fp), lambda b: (0, 0)),    # sin-lane mask
        ],
        out_specs=pl.BlockSpec((TB, Fp), lambda b: (b, 0)),
        compiler_params=pltpu.CompilerParams(
            dimension_semantics=("parallel",)),          # megacore sharding on v7x
    )(x_in, gmat, scale, shift, sinm)

    if Bp != B or Fp != F:
        out_flat = out_flat[:B, :F]
    # .view(n_batch, output_dim, -1): pure row-major reinterpret (metadata only).
    return out_flat.reshape(B, od, D)


def time2vec_ref(x, w0, phi0, W, Phi):
    """Pure-JAX reference mirroring the PyTorch module line by line."""
    B, D = x.shape
    k = W.shape[1]
    original = (x * w0 + phi0)[..., None]
    xr = jnp.repeat(x, k, axis=0).reshape(B, -1, k)
    s = jnp.sin(xr * W + Phi)
    return jnp.concatenate([original, s], axis=-1).reshape(B, k + 1, -1)


if __name__ == "__main__":
    input_dim, output_dim = 8, 16
    k = output_dim - 1

    key = jax.random.PRNGKey(0)
    kx, kw0, kphi0, kW, kPhi, kx2 = jax.random.split(key, 6)

    # Deterministic params matching nn.init.uniform_(param, 0, 1) shapes.
    w0 = jax.random.uniform(kw0, (1, input_dim), dtype=jnp.float32)
    phi0 = jax.random.uniform(kphi0, (1, input_dim), dtype=jnp.float32)
    W = jax.random.uniform(kW, (input_dim, k), dtype=jnp.float32)
    Phi = jax.random.uniform(kPhi, (input_dim, k), dtype=jnp.float32)

    # Small case (single block; batch internally padded to a sublane multiple).
    x = jax.random.normal(kx, (2, input_dim), dtype=jnp.float32)
    out = jax.block_until_ready(time2vec(x, w0, phi0, W, Phi))
    ref = time2vec_ref(x, w0, phi0, W, Phi)
    assert out.shape == (2, output_dim, input_dim), out.shape
    assert jnp.allclose(out, ref, atol=1e-5, rtol=1e-5), "mismatch vs reference (B=2)"

    # Multi-block grid path (exercises batch tiling and >= 2 grid steps).
    x2 = jax.random.normal(kx2, (64, input_dim), dtype=jnp.float32)
    out2 = jax.block_until_ready(time2vec(x2, w0, phi0, W, Phi, block_b=16))
    ref2 = time2vec_ref(x2, w0, phi0, W, Phi)
    assert out2.shape == (64, output_dim, input_dim), out2.shape
    assert jnp.allclose(out2, ref2, atol=1e-5, rtol=1e-5), "mismatch vs reference (B=64)"

    print("KERNEL_OK")
</pallas_src>

<mosaic_0001>
module attributes {stable_mosaic.version = 11 : i64} {
  func.func @_time2vec_kernel(%arg0: i32, %arg1: memref<8x8xf32, #tpu.memory_space<vmem>>, %arg2: memref<8x128xf32, #tpu.memory_space<vmem>>, %arg3: memref<1x128xf32, #tpu.memory_space<vmem>>, %arg4: memref<1x128xf32, #tpu.memory_space<vmem>>, %arg5: memref<1x128xi32, #tpu.memory_space<vmem>>, %arg6: memref<8x128xf32, #tpu.memory_space<vmem>>) attributes {dimension_semantics = [#tpu.dimension_semantics<parallel>], iteration_bounds = array<i64: 1>, scalar_prefetch = 0 : i64, scratch_operands = 0 : i64, tpu.core_type = #tpu.core_type<tc>, window_params = [{transform_indices = @transform_0, window_bounds = array<i64: 8, 8>}, {pipeline_mode = #tpu.pipeline_mode<synchronous>, transform_indices = @transform_1, window_bounds = array<i64: 8, 128>}, {pipeline_mode = #tpu.pipeline_mode<synchronous>, transform_indices = @transform_2, window_bounds = array<i64: 1, 128>}, {pipeline_mode = #tpu.pipeline_mode<synchronous>, transform_indices = @transform_3, window_bounds = array<i64: 1, 128>}, {pipeline_mode = #tpu.pipeline_mode<synchronous>, transform_indices = @transform_4, window_bounds = array<i64: 1, 128>}, {transform_indices = @transform_5, window_bounds = array<i64: 8, 128>}]} {
    %c0 = arith.constant 0 : index
    %c0_0 = arith.constant 0 : index
    %0 = vector.load %arg1[%c0, %c0_0] : memref<8x8xf32, #tpu.memory_space<vmem>>, vector<8x8xf32>
    %c0_1 = arith.constant 0 : index
    %c0_2 = arith.constant 0 : index
    %1 = vector.load %arg2[%c0_1, %c0_2] : memref<8x128xf32, #tpu.memory_space<vmem>>, vector<8x128xf32>
    %cst = arith.constant dense<0.000000e+00> : vector<8x128xf32>
    %2 = tpu.matmul %0, %1, %cst {dimension_numbers = #tpu.dot_dimension_numbers<[1], [0], [0], [1], [0, 0, 1, 1], [], []>, precision = #tpu.contract_precision<fp32>} : vector<8x8xf32>, vector<8x128xf32>, vector<8x128xf32> -> vector<8x128xf32>
    %c0_3 = arith.constant 0 : index
    %c0_4 = arith.constant 0 : index
    %3 = vector.load %arg3[%c0_3, %c0_4] : memref<1x128xf32, #tpu.memory_space<vmem>>, vector<1x128xf32>
    %4 = vector.broadcast %3 : vector<1x128xf32> to vector<8x128xf32>
    %5 = arith.mulf %2, %4 : vector<8x128xf32>
    %c0_5 = arith.constant 0 : index
    %c0_6 = arith.constant 0 : index
    %6 = vector.load %arg4[%c0_5, %c0_6] : memref<1x128xf32, #tpu.memory_space<vmem>>, vector<1x128xf32>
    %7 = vector.broadcast %6 : vector<1x128xf32> to vector<8x128xf32>
    %8 = arith.addf %5, %7 : vector<8x128xf32>
    %c0_7 = arith.constant 0 : index
    %c0_8 = arith.constant 0 : index
    %9 = vector.load %arg5[%c0_7, %c0_8] : memref<1x128xi32, #tpu.memory_space<vmem>>, vector<1x128xi32>
    %c0_i32 = arith.constant 0 : i32
    %10 = vector.broadcast %c0_i32 : i32 to vector<1x128xi32>
    %11 = arith.cmpi ne, %9, %10 : vector<1x128xi32>
    %12 = math.sin %8 : vector<8x128xf32>
    %13 = vector.shape_cast %11 : vector<1x128xi1> to vector<1x128xi1>
    %14 = vector.broadcast %13 : vector<1x128xi1> to vector<8x128xi1>
    %15 = arith.select %14, %12, %8 : vector<8x128xi1>, vector<8x128xf32>
    %c0_9 = arith.constant 0 : index
    %c0_10 = arith.constant 0 : index
    %16 = vector.load %arg6[%c0_9, %c0_10] : memref<8x128xf32, #tpu.memory_space<vmem>>, vector<8x128xf32>
    tpu.vector_store %arg6[%c0_9, %c0_10], %15 {strides = array<i32>} : memref<8x128xf32, #tpu.memory_space<vmem>>, vector<8x128xf32>,
    return
  }
  func.func @transform_0(%arg0: i32) -> (i32, i32) {
    %c0_i32 = arith.constant 0 : i32
    %c0_i32_0 = arith.constant 0 : i32
    return %arg0, %c0_i32 : i32, i32
  }
  func.func @transform_1(%arg0: i32) -> (i32, i32) {
    %c0_i32 = arith.constant 0 : i32
    %c0_i32_0 = arith.constant 0 : i32
    %c0_i32_1 = arith.constant 0 : i32
    return %c0_i32, %c0_i32_0 : i32, i32
  }
  func.func @transform_2(%arg0: i32) -> (i32, i32) {
    %c0_i32 = arith.constant 0 : i32
    %c0_i32_0 = arith.constant 0 : i32
    %c0_i32_1 = arith.constant 0 : i32
    return %c0_i32, %c0_i32_0 : i32, i32
  }
  func.func @transform_3(%arg0: i32) -> (i32, i32) {
    %c0_i32 = arith.constant 0 : i32
    %c0_i32_0 = arith.constant 0 : i32
    %c0_i32_1 = arith.constant 0 : i32
    return %c0_i32, %c0_i32_0 : i32, i32
  }
  func.func @transform_4(%arg0: i32) -> (i32, i32) {
    %c0_i32 = arith.constant 0 : i32
    %c0_i32_0 = arith.constant 0 : i32
    %c0_i32_1 = arith.constant 0 : i32
    return %c0_i32, %c0_i32_0 : i32, i32
  }
  func.func @transform_5(%arg0: i32) -> (i32, i32) {
    %c0_i32 = arith.constant 0 : i32
    %c0_i32_0 = arith.constant 0 : i32
    return %arg0, %c0_i32 : i32, i32
  }
}

</mosaic_0001>

<bundles_post_ra>
// kernel: tpu_custom_call.1
= control target key start
LH: loop header
LB: loop body
LE: loop exit
PB: predicated region body
PF: predicated region fallthrough
CT: control target
= control target key end

     0   :  { %10 = vsyncpa [#allocation3], 0  ;;  %s907_s0 = inlined_call_operand.hbm [shape: f32[8,8], index: 0, kind: input, shape index: {}]   ;;  %s908_s1 = inlined_call_operand.hbm [shape: f32[8,128], index: 1, kind: input, shape index: {}]   ;;  %s909_s2 = inlined_call_operand.vmem [shape: f32[1,128], index: 2, kind: input, shape index: {}]   ;;  %s910_s3 = inlined_call_operand.vmem [shape: f32[1,128], index: 3, kind: input, shape index: {}]   ;;  %s911_s4 = inlined_call_operand.vmem [shape: s32[1,128], index: 4, kind: input, shape index: {}]   ;;  %s912_s5 = inlined_call_operand.hbm [shape: f32[8,128], index: 5, kind: output, shape index: {}]  }
   0x1   :  { %11 = vsyncpa [#allocation6], 0 }
   0x2   :  { %12 = vsyncpa [#allocation4], 0  ;;  %s792_s18 = smov [#allocation2]   ;;  %s793_s20 = smov [#allocation5]  }
   0x3   :  { %s19_s19 = sshll.u32 %s792_s18, 4  ;;  %s29_s21 = sshll.u32 %s793_s20, 4  ;;  %s20_s19 = int_to_ptr.vmem [resolvable:$true] %s19_s19  ;;  %s30_s21 = int_to_ptr.vmem [resolvable:$true] %s29_s21 }
   0x4   :  { %s720_s24 = scalar_lea.hbm %s907_s0, 128 }
   0x5   :  { %p721_p0 = scmp.ne.s32.totalorder %s907_s0, %s720_s24  ;;  %p724_p1 = scmp.lt.u32.totalorder %s720_s24, %s907_s0 }
   0x7   :  { %p726_p2 = pnand %p724_p1, %p721_p0 }
   0x9   :  { %729 = shalt.err (!%p726_p2)
}
   0xa   :  { %s730_s29 = scalar_lea.vmem %s20_s19, 128  ;;  %p735_p4 = scmp.lt.s32.totalorder %s20_s19, %s20_s19 }
   0xb   :  { %p731_p3 = scmp.ne.s32.totalorder %s20_s19, %s730_s29  ;;  %p736_p5 = scmp.lt.s32.totalorder %s730_s29, %s730_s29 }
   0xd   :  { %p737_p6 = por %p736_p5, %p735_p4 }
   0xf   :  { %p738_p7 = pnand %p737_p6, %p731_p3 }
  0x11   :  { %741 = shalt.err (!%p738_p7)
}
  0x12   :  { %22 = dma.hbm_to_vmem [thread:$0]  %s907_s0, 128, %s20_s19, [#allocation3]  }
  0x13   :  { %s742_s9 = scalar_lea.hbm %s908_s1, 128 }
  0x14   :  { %p743_p8 = scmp.ne.s32.totalorder %s908_s1, %s742_s9  ;;  %p746_p9 = scmp.lt.u32.totalorder %s742_s9, %s908_s1 }
  0x16   :  { %p748_p10 = pnand %p746_p9, %p743_p8 }
  0x18   :  { %751 = shalt.err (!%p748_p10)
}
  0x19   :  { %s752_s14 = scalar_lea.vmem %s30_s21, 128  ;;  %p757_p12 = scmp.lt.s32.totalorder %s30_s21, %s30_s21 }
  0x1a   :  { %p753_p11 = scmp.ne.s32.totalorder %s30_s21, %s752_s14  ;;  %p758_p13 = scmp.lt.s32.totalorder %s752_s14, %s752_s14 }
  0x1c   :  { %p759_p0 = por %p758_p13, %p757_p12 }
  0x1e   :  { %p760_p1 = pnand %p759_p0, %p753_p11 }
  0x20   :  { %763 = shalt.err (!%p760_p1)
}
  0x21   :  { %32 = dma.hbm_to_vmem [thread:$0]  %s908_s1, 128, %s30_s21, [#allocation6]  }
  0x22   :  { %786 = dma.done.wait [#allocation3], 128  }
  0x23   :  { %787 = vsyncadd [#allocation3], 4294967168 }
  0x24   :  { %788 = dma.done.wait [#allocation6], 128  }
  0x25   :  { %789 = vsyncadd [#allocation6], 4294967168  ;;  %v794_v0 = vmov 0.0   ;;  %vm795_vm0 = vmmov 0   ;;  %vm47_vm1 = vcmask 64512   ;;  %v46_v1 = vld [vmem:[#allocation5] sm:$0xff] }
  0x26   :  { %676 = vmatprep.subr.mxu0 %v794_v0  ;;  %678 = vmatprep.mubr.msk.f32.mxu0 %vm795_vm0, %v794_v0  ;;  %v45_v2 = vld [vmem:[#allocation2] sm:$0xff]  ;;  %v52_v3 = vand.u32 4294901760, %v46_v1  ;;  %v796_v33 = vmov 683565275   ;;  %v797_v35 = vmov 2475754826  }
  0x27   :  { %661 = vmatprep.subr.mxu1 %v794_v0  ;;  %663 = vmatprep.mubr.msk.f32.mxu1 %vm795_vm0, %v794_v0  ;;  %v49_v4 = vsel %vm47_vm1, %v45_v2, 0  ;;  %v643_v17 = vld [vmem:[%s909_s2] ss:$0 sm:$0xff]  ;;  %v798_v38 = vmov 2131351028   ;;  %s803_s19 = smov [#allocation7]  }
  0x28   :  { %v117_v5 = vand.u32 4294901760, %v49_v4  ;;  %v129_v6 = vsub.f32 %v46_v1, %v52_v3  ;;  %677 = vmatpush3.msra.mxu0 %v52_v3  ;;  %662 = vmatpush3.msra.mxu1 %v52_v3  ;;  %v644_v20 = vld [vmem:[%s910_s3] ss:$0 sm:$0xff]  ;;  %v799_v41 = vmov 2102212464   ;;  %s633_s20 = sshll.u32 %s803_s19, 4  ;;  %s634_s20 = int_to_ptr.vmem [resolvable:$true] %s633_s20 }
  0x29   :  { %666 = vmatprep.subr.mxu1 %v794_v0  ;;  %681 = vmatprep.subr.mxu0 %v794_v0  ;;  %v800_v44 = vmov 920167782   ;;  %v801_v47 = vmov 1326507024   ;;  %p769_p3 = scmp.lt.s32.totalorder %s634_s20, %s634_s20 }
  0x2a   :  { %v118_v7 = vsub.f32 %v49_v4, %v117_v5  ;;  %v130_v8 = vand.u32 4294901760, %v129_v6 }
  0x2c   :  { %v119_v9 = vand.u32 4294901760, %v118_v7  ;;  %v131_v10 = vsub.f32 %v129_v6, %v130_v8 }
  0x2e   :  { %679 = vmatmul.mubr.f32.vlgmr.msra.gmra.mrb[0].mxu0 %v119_v9  ;;  %v120_v11 = vsub.f32 %v118_v7, %v119_v9  ;;  %v132_v12 = vand.u32 4294901760, %v131_v10 }
  0x2f   :  { %682 = vmatpush3.msra.mxu0 %v130_v8  ;;  %683 = vmatprep.mubr.msk.f32.mxu0 %vm795_vm0, %v794_v0 }
  0x30   :  { %v121_v13 = vand.u32 4294901760, %v120_v11  ;;  %686 = vmatprep.subr.mxu0 %v794_v0 }
  0x32   :  { %664 = vmatmul.mubr.f32.vlgmr.msra.gmra.mrb[0].mxu1 %v121_v13 }
  0x33   :  { %667 = vmatpush3.msra.mxu1 %v132_v12  ;;  %668 = vmatprep.mubr.msk.f32.mxu1 %vm795_vm0, %v794_v0 }
  0x34   :  { %671 = vmatprep.subr.mxu1 %v794_v0 }
  0x36   :  { %684 = vmatmul.mubr.f32.vlgmr.msra.gmra.mrb[0].mxu0 %v117_v5 }
  0x37   :  { %687 = vmatpush3.msra.mxu0 %v52_v3  ;;  %688 = vmatprep.mubr.msk.f32.mxu0 %vm795_vm0, %v794_v0 }
  0x3a   :  { %669 = vmatmul.mubr.f32.vlgmr.msra.gmra.mrb[0].mxu1 %v117_v5 }
  0x3b   :  { %672 = vmatpush3.msra.mxu1 %v129_v6  ;;  %673 = vmatprep.mubr.msk.f32.mxu1 %vm795_vm0, %v794_v0 }
  0x3e   :  { %689 = vmatmul.mubr.f32.vlgmr.msra.gmra.mrb[0].mxu0 %v117_v5 }
  0x42   :  { %674 = vmatmul.mubr.f32.vlgmr.msra.gmra.mrb[0].mxu1 %v118_v7 }
 0x111   :  { %v493_v14 = vpop.f32.mrb[0].mxu0 }
 0x112   :  { %v690_v15 = vpop.f32.mrb[1].mxu0 }
 0x115   :  { %v273_v16 = vpop.f32.mrb[0].mxu1 }
 0x116   :  { %v691_v18 = vadd.f32 %v493_v14, %v273_v16  ;;  %v675_v19 = vpop.f32.mrb[1].mxu1 }
 0x118   :  { %v504_v21 = vmul.f32 %v691_v18, %v643_v17 }
 0x11a   :  { %v870_v22 = vadd.f32 %v644_v20, %v504_v21 }
 0x11c   :  { %v518_v23 = vand.u32 2139095040, %v870_v22  ;;  %v515_v27 = vand.u32 2147483647, %v870_v22  ;;  %vm517_vm9 = vcmp.lt.s32.totalorder %v870_v22, 0  ;;  %vm607_vm0 = vweird.f32 %v870_v22 }
 0x11e   :  { %v519_v24 = vshrl.u32 %v518_v23, 23  ;;  %v522_v31 = vand.u32 8388607, %v515_v27  ;;  %vm516_vm10 = vcmp.le.f32.partialorder %v515_v27, 0.7853982 }
 0x120   :  { %v645_v25 = vadd.s32 4294967169, %v519_v24  ;;  %v523_v49 = vor.u32 8388608, %v522_v31 }
 0x122   :  { %v525_v26 = vadd.s32 1, %v645_v25  ;;  %v563_v63 = vshll.u32 %v523_v49, 8 }
 0x124   :  { %vm526_vm2 = vcmp.gt.s32.totalorder %v525_v26, 0 }
 0x125   :  { %v527_v28 = vsel %vm526_vm2, %v525_v26, 0 }
 0x126   :  { %v529_v29 = vand.u32 31, %v527_v28  ;;  %v528_v32 = vshrl.u32 %v527_v28, 5 }
 0x128   :  { %v530_v30 = vsub.s32 32, %v529_v29  ;;  %v532_v34 = vshll.u32 %v796_v33, %v529_v29  ;;  %v535_v36 = vshll.u32 %v797_v35, %v529_v29  ;;  %v538_v40 = vshll.u32 %v798_v38, %v529_v29 }
 0x129   :  { %v541_v43 = vshll.u32 %v799_v41, %v529_v29  ;;  %v544_v46 = vshll.u32 %v800_v44, %v529_v29  ;;  %vm547_vm3 = vcmp.lt.s32.totalorder %v528_v32, 1  ;;  %vm550_vm4 = vcmp.lt.s32.totalorder %v528_v32, 4 }
 0x12a   :  { %v533_v37 = vshrl.u32 %v797_v35, %v530_v30  ;;  %v536_v39 = vshrl.u32 %v798_v38, %v530_v30  ;;  %v539_v42 = vshrl.u32 %v799_v41, %v530_v30  ;;  %v542_v45 = vshrl.u32 %v800_v44, %v530_v30 }
 0x12b   :  { %v545_v48 = vshrl.u32 %v801_v47, %v530_v30  ;;  %v531_v58 = vshrl.u32 %v796_v33, %v530_v30  ;;  %vm549_vm5 = vcmp.lt.s32.totalorder %v528_v32, 3  ;;  %vm548_vm6 = vcmp.lt.s32.totalorder %v528_v32, 2 }
 0x12c   :  { %v534_v50 = vor.u32 %v533_v37, %v532_v34  ;;  %v537_v51 = vor.u32 %v536_v39, %v535_v36  ;;  %v540_v52 = vor.u32 %v539_v42, %v538_v40  ;;  %v543_v53 = vor.u32 %v542_v45, %v541_v43  ;;  %v513_v42 = vld [vmem:[%s911_s4] sm:$0x1]  ;;  %s764_s4 = scalar_lea.vmem %s634_s20, 128 }
 0x12d   :  { %v546_v54 = vor.u32 %v545_v48, %v544_v46  ;;  %v620_v40 = vlaneseq  ;;  %vm514_vm11 = vcmp.ne.s32.totalorder %v513_v42, 0  ;;  %v802_v47 = vmov 0   ;;  %p765_p2 = scmp.ne.s32.totalorder %s634_s20, %s764_s4  ;;  %p770_p4 = scmp.lt.s32.totalorder %s764_s4, %s764_s4 }
 0x12e   :  { %v552_v55 = vsel %vm550_vm4, %v540_v52, 2102212464  ;;  %v555_v56 = vsel %vm547_vm3, %v534_v50, %v537_v51  ;;  %v559_v57 = vsel %vm547_vm3, %v537_v51, %v540_v52  ;;  %v556_v59 = vsel %vm550_vm4, %v543_v53, 920167782 }
 0x12f   :  { %v560_v60 = vsel %vm550_vm4, %v546_v54, 1326507024  ;;  %v557_v61 = vsel %vm549_vm5, %v540_v52, %v556_v59  ;;  %v551_v0 = vsel %vm547_vm3, %v531_v58, %v534_v50  ;;  %v553_v1 = vsel %vm549_vm5, %v537_v51, %v552_v55  ;;  %p771_p5 = por %p770_p4, %p769_p3 }
 0x130   :  { %v561_v62 = vsel %vm549_vm5, %v543_v53, %v560_v60  ;;  %v558_v2 = vsel %vm548_vm6, %v555_v56, %v557_v61  ;;  %v554_v8 = vsel %vm548_vm6, %v551_v0, %v553_v1  ;;  %v621_v44 = vshrl.u32 %v620_v40, 7 }
 0x131   :  { %v562_v3 = vsel %vm548_vm6, %v559_v57, %v561_v62  ;;  %v879_v6 = vmul.u32.u64.low %v563_v63, %v558_v2  ;;  %v880_v7 = vmul.u32.u64.high %v563_v63, %v558_v2, %v879_v6  ;;  %v570_v10 = vmul.u32 %v563_v63, %v554_v8  ;;  %p772_p6 = pnand %p771_p5, %p765_p2 }
 0x132   :  { %v876_v4 = vmul.u32.u64.low %v563_v63, %v562_v3  ;;  %v877_v5 = vmul.u32.u64.high %v563_v63, %v562_v3, %v876_v4  ;;  %v622_v46 = vsub.s32 0, %v621_v44  ;;  %v619_v48 = vsel %vm514_vm11, 1, %v802_v47 }
 0x133   :  { %v573_v9 = vadd.s32 1, %v880_v7 }
 0x134   :  { %vm572_vm7 = vc.u32 %v877_v5, %v879_v6  ;;  %v571_v23 = vadd.s32 %v879_v6, %v877_v5  ;;  %v623_v50 = vrot.slane %v619_v48, %v622_v46 }
 0x135   :  { %v574_v11 = vsel %vm572_vm7, %v573_v9, %v880_v7 }
 0x136   :  { %v575_v12 = vadd.s32 %v574_v11, %v570_v10  ;;  %vm624_vm15 = vcmp.eq.s32.totalorder %v623_v50, 1 }
 0x138   :  { %v576_v13 = vadd.s32 536870912, %v575_v12 }
 0x13a   :  { %v577_v14 = vshrl.u32 %v576_v13, 30 }
 0x13c   :  { %v578_v15 = vshll.u32 %v577_v14, 30  ;;  %v601_v36 = vsub.s32 4, %v577_v14 }
 0x13e   :  { %v579_v16 = vsub.s32 %v575_v12, %v578_v15  ;;  %v602_v39 = vsel %vm517_vm9, %v601_v36, %v577_v14 }
 0x13f   :  { %v604_v43 = vsel %vm516_vm10, 0, %v602_v39 }
 0x140   :  { %v581_v17 = vsub.s32 0, %v579_v16  ;;  %v608_v45 = vadd.s32 3, %v604_v43 }
 0x142   :  { %v646_v18 = vmin.u32 %v581_v17, %v579_v16  ;;  %v609_v49 = vand.u32 3, %v608_v45 }
 0x144   :  { %v583_v19 = vclz %v646_v18  ;;  %vm614_vm12 = vcmp.eq.s32.totalorder %v609_v49, 2  ;;  %vm611_vm13 = vcmp.eq.s32.totalorder %v609_v49, 0  ;;  %vm610_vm14 = vcmp.lt.s32.totalorder %v609_v49, 2 }
 0x146   :  { %v647_v20 = vadd.s32 4294967294, %v583_v19 }
 0x148   :  { %vm648_vm8 = vcmp.lt.s32.totalorder %v647_v20, 0 }
 0x149   :  { %v586_v21 = vsel %vm648_vm8, 0, %v647_v20 }
 0x14a   :  { %v587_v24 = vsub.s32 32, %v586_v21  ;;  %v591_v25 = vsub.s32 4294967266, %v586_v21  ;;  %v588_v26 = vshll.u32 %v579_v16, %v586_v21 }
 0x14c   :  { %v589_v28 = vshrl.u32 %v571_v23, %v587_v24  ;;  %v592_v29 = vadd.s32 127, %v591_v25 }
 0x14e   :  { %v590_v30 = vor.u32 %v589_v28, %v588_v26  ;;  %v593_v31 = vshll.u32 %v592_v29, 23 }
 0x150   :  { %v594_v32 = vor.u32 4788187, %v593_v31  ;;  %v597_v34 = vcvt.s32.f32 %v590_v30 }
 0x152   :  { %v595_v33 = vand.u32 2147483647, %v594_v32 }
 0x154   :  { %v598_v35 = vmul.f32 %v597_v34, %v595_v33 }
 0x156   :  { %v599_v37 = vxor.u32 2147483648, %v598_v35 }
 0x158   :  { %v600_v38 = vsel %vm517_vm9, %v599_v37, %v598_v35 }
 0x159   :  { %v603_v41 = vsel %vm516_vm10, %v870_v22, %v600_v38 }
 0x15a   :  { %716 = vcosq.f32 %v603_v41 }
 0x15b   :  { %718 = vsinq.f32 %v603_v41 }
 0x164   :  { %v717_v27 = vpop.eup %716 }
 0x165   :  { %v719_v51 = vpop.eup %718  ;;  %v615_v52 = vxor.u32 2147483648, %v717_v27 }
 0x166   :  { %v612_v53 = vxor.u32 2147483648, %v719_v51 }
 0x167   :  { %v616_v54 = vsel %vm614_vm12, %v615_v52, %v719_v51 }
 0x168   :  { %v613_v55 = vsel %vm611_vm13, %v717_v27, %v612_v53 }
 0x169   :  { %v617_v56 = vsel %vm610_vm14, %v613_v55, %v616_v54 }
 0x16a   :  { %v618_v57 = vsel %vm607_vm0, nan, %v617_v56 }
 0x16b   :  { %v625_v58 = vsel %vm624_vm15, %v618_v57, %v870_v22 }
 0x16c   :  { %626 = vst [vmem:[#allocation7] sm:$0xff] %v625_v58 }
 0x16d   :  { %775 = shalt.err (!%p772_p6)
}
 0x16e   :  { %s776_s23 = scalar_lea.hbm %s912_s5, 128 }
 0x16f   :  { %p777_p7 = scmp.ne.s32.totalorder %s912_s5, %s776_s23  ;;  %p780_p8 = scmp.lt.u32.totalorder %s776_s23, %s912_s5 }
 0x171   :  { %p782_p9 = pnand %p780_p8, %p777_p7 }
 0x173   :  { %785 = shalt.err (!%p782_p9)
}
 0x174   :  { %636 = dma.vmem_to_hbm [thread:$0]  %s634_s20, 128, %s912_s5, [#allocation4]  }
 0x175   :  { %790 = dma.done.wait [#allocation4], 128  }
 0x176   :  { %791 = vsyncadd [#allocation4], 4294967168 }
 0x177   :  { %640 = vsyncpa [#allocation3], 1 }
 0x178   :  { %641 = vsyncpa [#allocation6], 1 }
 0x179   :  { %642 = vsyncpa [#allocation4], 1 }

</bundles_post_ra>
